<compile_context>
chip_gen: v7x
topology: tpu7x:2x2x1
jax: 0.10.0
libtpu: 0.0.40
codegen_flags: <defaults>
</compile_context>

<pallas_src>
import jax
import jax.numpy as jnp
from jax.experimental import pallas as pl
from jax.experimental.pallas import tpu as pltpu

LANE = 128


def _round_up(n, m):
    return ((n + m - 1) // m) * m


def policy_kernel(x_ref, w1_ref, b1_ref, w2_ref, b2_ref, out_ref):
    # One batch tile per grid step; weights/biases are the same (resident)
    # block every step.
    x = x_ref[...].astype(jnp.float32)

    # Linear 1 + ReLU (hidden dim padded to 128 lanes; pad columns are zero,
    # so padded hidden units are exactly 0 after ReLU and contribute nothing).
    h = jnp.dot(x, w1_ref[...], preferred_element_type=jnp.float32) + b1_ref[...]
    h = jnp.maximum(h, 0.0)

    # Linear 2 (output dim padded to 128 lanes; padded lanes carry a -1e30
    # bias so they vanish under exp below).
    logits = jnp.dot(h, w2_ref[...], preferred_element_type=jnp.float32) + b2_ref[...]

    # Numerically stable softmax over the (padded) last axis.
    m = jnp.max(logits, axis=-1, keepdims=True)
    e = jnp.exp(logits - m)                      # padded lanes -> exp(-huge) = 0
    denom = jnp.sum(e, axis=-1, keepdims=True)
    # approx=False keeps the 1e-5 tolerance; approx=True would offload to EUP.
    out_ref[...] = (e * pl.reciprocal(denom, approx=False)).astype(out_ref.dtype)


def policy_network_forward(x, w1, b1, w2, b2, *, block_b=512):
    """x: [B, I]; w1: [I, H]; b1: [1, H]; w2: [H, O]; b2: [1, O] -> [B, O].

    block_b: rows per batch tile (>= 512 recommended for large B so the
    ~0.35 us per-grid-step overhead is amortized; clamped for small B).
    """
    B, I = x.shape
    H = w1.shape[1]
    O = w2.shape[1]

    H_pad = _round_up(max(H, LANE), LANE)
    O_pad = _round_up(max(O, LANE), LANE)

    # Pad parameters once, outside the kernel.
    w1_p = jnp.zeros((I, H_pad), jnp.float32).at[:, :H].set(w1.astype(jnp.float32))
    b1_p = jnp.zeros((1, H_pad), jnp.float32).at[:, :H].set(
        b1.reshape(1, H).astype(jnp.float32))
    w2_p = jnp.zeros((H_pad, O_pad), jnp.float32).at[:H, :O].set(w2.astype(jnp.float32))
    # Padded output lanes get a huge negative bias -> zero softmax probability.
    b2_p = jnp.full((1, O_pad), -1e30, jnp.float32).at[:, :O].set(
        b2.reshape(1, O).astype(jnp.float32))

    # Batch tiling: pad B up to a multiple of the tile so every block is full.
    TB = min(block_b, _round_up(B, 8))
    B_pad = _round_up(B, TB)
    x_p = x.astype(jnp.float32)
    if B_pad != B:
        x_p = jnp.zeros((B_pad, I), jnp.float32).at[:B, :].set(x_p)

    out = pl.pallas_call(
        policy_kernel,
        out_shape=jax.ShapeDtypeStruct((B_pad, O_pad), jnp.float32),
        grid=(B_pad // TB,),
        in_specs=[
            pl.BlockSpec((TB, I), lambda i: (i, 0)),         # x: streamed per tile
            pl.BlockSpec((I, H_pad), lambda i: (0, 0)),      # w1: VMEM-resident
            pl.BlockSpec((1, H_pad), lambda i: (0, 0)),      # b1: VMEM-resident
            pl.BlockSpec((H_pad, O_pad), lambda i: (0, 0)),  # w2: VMEM-resident
            pl.BlockSpec((1, O_pad), lambda i: (0, 0)),      # b2: VMEM-resident
        ],
        out_specs=pl.BlockSpec((TB, O_pad), lambda i: (i, 0)),  # lane-dense output
        compiler_params=pltpu.CompilerParams(
            dimension_semantics=("parallel",),  # independent batch tiles
        ),
    )(x_p, w1_p, b1_p, w2_p, b2_p)

    # Strip batch and output-lane padding.
    return out[:B, :O]


if __name__ == "__main__":
    # Small shapes consistent with the module: input_size=16, hidden=32, output=8.
    batch, input_size, hidden_size, output_size = 50, 16, 32, 8

    key = jax.random.PRNGKey(0)
    kx, k1, kb1, k2, kb2 = jax.random.split(key, 5)

    x = jax.random.normal(kx, (batch, input_size), dtype=jnp.float32)

    # Deterministic init (mimics nn.Linear's uniform(-1/sqrt(fan_in), 1/sqrt(fan_in))).
    bound1 = 1.0 / (input_size ** 0.5)
    w1 = jax.random.uniform(k1, (input_size, hidden_size), jnp.float32, -bound1, bound1)
    b1 = jax.random.uniform(kb1, (1, hidden_size), jnp.float32, -bound1, bound1)
    bound2 = 1.0 / (hidden_size ** 0.5)
    w2 = jax.random.uniform(k2, (hidden_size, output_size), jnp.float32, -bound2, bound2)
    b2 = jax.random.uniform(kb2, (1, output_size), jnp.float32, -bound2, bound2)

    # Pure-JAX reference of the forward semantics.
    h_ref = jnp.maximum(x @ w1 + b1, 0.0)
    ref = jax.nn.softmax(h_ref @ w2 + b2, axis=-1)

    # 1) Multi-tile path (small block_b forces grid=(4,) with batch padding).
    out_tiled = jax.block_until_ready(
        policy_network_forward(x, w1, b1, w2, b2, block_b=16))
    # 2) Single-tile path (default block_b covers the whole small batch).
    out_single = jax.block_until_ready(
        policy_network_forward(x, w1, b1, w2, b2))

    for out in (out_tiled, out_single):
        assert out.shape == (batch, output_size)
        assert jnp.allclose(out, ref, atol=1e-5, rtol=1e-5)
        assert jnp.allclose(jnp.sum(out, axis=-1), 1.0, atol=1e-5)

    print("KERNEL_OK")
</pallas_src>

<mosaic_0001>
module attributes {stable_mosaic.version = 11 : i64} {
  func.func @policy_kernel(%arg0: i32, %arg1: memref<16x16xf32, #tpu.memory_space<vmem>>, %arg2: memref<16x128xf32, #tpu.memory_space<vmem>>, %arg3: memref<1x128xf32, #tpu.memory_space<vmem>>, %arg4: memref<128x128xf32, #tpu.memory_space<vmem>>, %arg5: memref<1x128xf32, #tpu.memory_space<vmem>>, %arg6: memref<16x128xf32, #tpu.memory_space<vmem>>) attributes {dimension_semantics = [#tpu.dimension_semantics<parallel>], iteration_bounds = array<i64: 4>, scalar_prefetch = 0 : i64, scratch_operands = 0 : i64, tpu.core_type = #tpu.core_type<tc>, window_params = [{transform_indices = @transform_0, window_bounds = array<i64: 16, 16>}, {pipeline_mode = #tpu.pipeline_mode<synchronous>, transform_indices = @transform_1, window_bounds = array<i64: 16, 128>}, {pipeline_mode = #tpu.pipeline_mode<synchronous>, transform_indices = @transform_2, window_bounds = array<i64: 1, 128>}, {pipeline_mode = #tpu.pipeline_mode<synchronous>, transform_indices = @transform_3, window_bounds = array<i64: 128, 128>}, {pipeline_mode = #tpu.pipeline_mode<synchronous>, transform_indices = @transform_4, window_bounds = array<i64: 1, 128>}, {transform_indices = @transform_5, window_bounds = array<i64: 16, 128>}]} {
    %c0 = arith.constant 0 : index
    %c0_0 = arith.constant 0 : index
    %0 = vector.load %arg1[%c0, %c0_0] : memref<16x16xf32, #tpu.memory_space<vmem>>, vector<16x16xf32>
    %c0_1 = arith.constant 0 : index
    %c0_2 = arith.constant 0 : index
    %1 = vector.load %arg2[%c0_1, %c0_2] : memref<16x128xf32, #tpu.memory_space<vmem>>, vector<16x128xf32>
    %cst = arith.constant dense<0.000000e+00> : vector<16x128xf32>
    %2 = tpu.matmul %0, %1, %cst {dimension_numbers = #tpu.dot_dimension_numbers<[1], [0], [0], [1], [0, 0, 1, 1], [], []>} : vector<16x16xf32>, vector<16x128xf32>, vector<16x128xf32> -> vector<16x128xf32>
    %c0_3 = arith.constant 0 : index
    %c0_4 = arith.constant 0 : index
    %3 = vector.load %arg3[%c0_3, %c0_4] : memref<1x128xf32, #tpu.memory_space<vmem>>, vector<1x128xf32>
    %4 = vector.broadcast %3 : vector<1x128xf32> to vector<16x128xf32>
    %5 = arith.addf %2, %4 : vector<16x128xf32>
    %cst_5 = arith.constant 0.000000e+00 : f32
    %6 = vector.broadcast %cst_5 : f32 to vector<16x128xf32>
    %7 = arith.maximumf %5, %6 : vector<16x128xf32>
    %c0_6 = arith.constant 0 : index
    %c0_7 = arith.constant 0 : index
    %8 = vector.load %arg4[%c0_6, %c0_7] : memref<128x128xf32, #tpu.memory_space<vmem>>, vector<128x128xf32>
    %cst_8 = arith.constant dense<0.000000e+00> : vector<16x128xf32>
    %9 = tpu.matmul %7, %8, %cst_8 {dimension_numbers = #tpu.dot_dimension_numbers<[1], [0], [0], [1], [0, 0, 1, 1], [], []>} : vector<16x128xf32>, vector<128x128xf32>, vector<16x128xf32> -> vector<16x128xf32>
    %c0_9 = arith.constant 0 : index
    %c0_10 = arith.constant 0 : index
    %10 = vector.load %arg5[%c0_9, %c0_10] : memref<1x128xf32, #tpu.memory_space<vmem>>, vector<1x128xf32>
    %11 = vector.broadcast %10 : vector<1x128xf32> to vector<16x128xf32>
    %12 = arith.addf %9, %11 : vector<16x128xf32>
    %cst_11 = arith.constant dense<0xFF800000> : vector<16xf32>
    %13 = vector.multi_reduction <maximumf>, %12, %cst_11 [1] : vector<16x128xf32> to vector<16xf32>
    %14 = vector.shape_cast %13 : vector<16xf32> to vector<16x1xf32>
    %15 = vector.broadcast %14 : vector<16x1xf32> to vector<16x128xf32>
    %16 = arith.subf %12, %15 : vector<16x128xf32>
    %17 = math.exp %16 : vector<16x128xf32>
    %cst_12 = arith.constant dense<0.000000e+00> : vector<16xf32>
    %18 = vector.multi_reduction <add>, %17, %cst_12 [1] : vector<16x128xf32> to vector<16xf32>
    %19 = vector.shape_cast %18 : vector<16xf32> to vector<16x1xf32>
    %20 = tpu.reciprocal %19 : vector<16x1xf32> -> vector<16x1xf32>
    %21 = vector.broadcast %20 : vector<16x1xf32> to vector<16x128xf32>
    %22 = arith.mulf %17, %21 : vector<16x128xf32>
    %c0_13 = arith.constant 0 : index
    %c0_14 = arith.constant 0 : index
    %23 = vector.load %arg6[%c0_13, %c0_14] : memref<16x128xf32, #tpu.memory_space<vmem>>, vector<16x128xf32>
    tpu.vector_store %arg6[%c0_13, %c0_14], %22 {strides = array<i32>} : memref<16x128xf32, #tpu.memory_space<vmem>>, vector<16x128xf32>,
    return
  }
  func.func @transform_0(%arg0: i32) -> (i32, i32) {
    %c0_i32 = arith.constant 0 : i32
    %c0_i32_0 = arith.constant 0 : i32
    return %arg0, %c0_i32 : i32, i32
  }
  func.func @transform_1(%arg0: i32) -> (i32, i32) {
    %c0_i32 = arith.constant 0 : i32
    %c0_i32_0 = arith.constant 0 : i32
    %c0_i32_1 = arith.constant 0 : i32
    return %c0_i32, %c0_i32_0 : i32, i32
  }
  func.func @transform_2(%arg0: i32) -> (i32, i32) {
    %c0_i32 = arith.constant 0 : i32
    %c0_i32_0 = arith.constant 0 : i32
    %c0_i32_1 = arith.constant 0 : i32
    return %c0_i32, %c0_i32_0 : i32, i32
  }
  func.func @transform_3(%arg0: i32) -> (i32, i32) {
    %c0_i32 = arith.constant 0 : i32
    %c0_i32_0 = arith.constant 0 : i32
    %c0_i32_1 = arith.constant 0 : i32
    return %c0_i32, %c0_i32_0 : i32, i32
  }
  func.func @transform_4(%arg0: i32) -> (i32, i32) {
    %c0_i32 = arith.constant 0 : i32
    %c0_i32_0 = arith.constant 0 : i32
    %c0_i32_1 = arith.constant 0 : i32
    return %c0_i32, %c0_i32_0 : i32, i32
  }
  func.func @transform_5(%arg0: i32) -> (i32, i32) {
    %c0_i32 = arith.constant 0 : i32
    %c0_i32_0 = arith.constant 0 : i32
    return %arg0, %c0_i32 : i32, i32
  }
}

</mosaic_0001>

<bundles_post_ra>
// kernel: tpu_custom_call.1
= control target key start
LH: loop header
LB: loop body
LE: loop exit
PB: predicated region body
PF: predicated region fallthrough
CT: control target
= control target key end

     0   :  { %10 = vsyncpa [#allocation3], 0  ;;  %s1006_s0 = inlined_call_operand.vmem [shape: f32[64,16], index: 0, kind: input, shape index: {}]   ;;  %s1007_s1 = inlined_call_operand.vmem [shape: f32[16,128], index: 1, kind: input, shape index: {}]   ;;  %s1008_s2 = inlined_call_operand.vmem [shape: f32[1,128], index: 2, kind: input, shape index: {}]   ;;  %s1009_s3 = inlined_call_operand.hbm [shape: f32[128,128], index: 3, kind: input, shape index: {}]   ;;  %s1010_s4 = inlined_call_operand.vmem [shape: f32[1,128], index: 4, kind: input, shape index: {}]   ;;  %s1011_s5 = inlined_call_operand.hbm [shape: f32[64,128], index: 5, kind: output, shape index: {}]  }
   0x1   :  { %11 = vsyncpa [#allocation4], 0 }
   0x2   :  { %13 = vsyncpa [#allocation4 + $0x1], 0  ;;  %s855_s18 = smov 0   ;;  %s857_s19 = smov 0  }
   0x3   :  { %s859_s20 = smov 0   ;;  %s861_s21 = smov 0  }
   0x4 LB: > { %s876_s22 = sadd.s32 4294967295, %s817_s21   ;;  %s542_s23 = sadd.s32 4294967294, %s817_s21   ;;  %s817_s21 = sphi %s861_s21, %s1027_s21   ;;  %s813_s20 = sphi %s859_s20, %s1026_s20   ;;  %s809_s19 = sphi %s857_s19, %s1025_s19   ;;  %s805_s18 = sphi %s855_s18, %s1024_s18  }
   0x5   : > { %s880_s24 = sadd.s32 1, %s817_s21   ;;  %s136_s25 = sadd.s32 1, %s813_s20 }
   0x6   : > { %s133_s26 = ssub.s32 %s817_s21, %s880_s24  ;;  %p146_p0 = scmp.ne.s32.totalorder %s813_s20, %s809_s19 }
   0x7   : > { %p134_p1 = scmp.eq.s32.totalorder %s133_s26, 0  ;;  %p147_p2 = scmp.eq.s32.totalorder %s876_s22, 3 }
   0x8   : > { %p152_p3 = scmp.ne.s32.totalorder %s809_s19, %s805_s18  ;;  %p153_p4 = scmp.eq.s32.totalorder %s542_s23, 3 }
   0x9   : > { %s891_s27 = scalar_select %p134_p1, %s813_s20, %s136_s25  }
   0xa   : > { %p893_p5 = por %p147_p2, %p146_p0  ;;  %p897_p6 = por %p153_p4, %p152_p3 }
   0xb   : > { %p543_p7 = scmp.ge.s32.totalorder %s817_s21, 1  ;;  %p160_p8 = scmp.lt.s32.totalorder %s817_s21, 5 }
   0xc   : > { %s1015_s28 = scalar_select %p893_p5, 1, 0 }
   0xd   : > { %s1016_s29 = scalar_select %p897_p6, 1, 0 }
   0xe   : > { %p1012_p9 = scmp.eq.s32.totalorder %s876_s22, 0  ;;  %p904_p10 = pnand %p543_p7, %p160_p8 }
   0xf   : > { %s819_s6 = smov [#allocation2]   ;;  %s723_s11 = scalar_lea.hbm %s1009_s3, 2048 }
  0x10   : > { %s1017_s30 = scalar_select %p904_p10, 1, 0 }
  0x11   : > { %s178_s7 = sshll.u32 %s819_s6, 4  ;;  %p667_p11 = pneg %p904_p10  ;;  %s179_s7 = int_to_ptr.vmem [resolvable:$true] %s178_s7 }
  0x12   : > { %p724_p13 = scmp.ne.s32.totalorder %s1009_s3, %s723_s11  ;;  %p730_p3 = scmp.lt.u32.totalorder %s723_s11, %s1009_s3 }
  0x13   : > { %p912_p12 = pnand %p1012_p9, %p667_p11 }
  0x15   : > { %p725_p0 = pneg %p912_p12 }
  0x17   : > { %p726_p1 = pnand %p725_p0, %p724_p13 }
  0x19   : > { %p727_p2 = pneg %p726_p1 }
  0x1b   : > { %p732_p4 = pnand %p730_p3, %p727_p2 }
  0x1d   : > { %735 = shalt.err (!%p732_p4)
}
  0x1e   : > { %s736_s16 = scalar_lea.vmem %s179_s7, 2048  ;;  %p744_p9 = scmp.lt.s32.totalorder %s179_s7, %s179_s7 }
  0x1f   : > { %p737_p7 = scmp.ne.s32.totalorder %s179_s7, %s736_s16  ;;  %p745_p6 = scmp.lt.s32.totalorder %s736_s16, %s736_s16 }
  0x21   : > { %p739_p8 = pnand %p737_p7, %p725_p0  ;;  %p746_p5 = por %p745_p6, %p744_p9 }
  0x23   : > { %p740_p11 = pneg %p739_p8 }
  0x25   : > { %p747_p10 = pnand %p746_p5, %p740_p11 }
  0x27   : > { %750 = shalt.err (!%p747_p10)
}
  0x28   : > { %s820_s17 = smov 128   ;;  %s821_s23 = smov 8  }
  0x29   : > { %670 = dma.hbm_to_vmem [thread:$0]  (!%p912_p12), %s1009_s3, 2048, %s179_s7, [#allocation3], %s820_s17, %s820_s17, %s821_s23  }
  0x2a   : > { %p1019_p13 = scmp.ne.s32.totalorder %s1017_s30, 0 }
  0x2b   : > { %p1020_p1 = scmp.eq.s32.totalorder (!%p1019_p13), %s876_s22, 0 }
  0x2c   : > { %206 = sbr.rel (%p1019_p13) target bundleno = 824 (0x338), region = 40 }
  0x33   : > { %796 = dma.done.wait (%p1020_p1), [#allocation3], 2048   ;;  %p1021_p0 = pmov %p1020_p1 }
  0x34   : > { %s549_s6 = sshll.u32 %s876_s22, 1  ;;  %vm252_vm0 = vcmask 130048   ;;  %v243_v0 = vld [vmem:[%s1007_s1] sm:$0xff]  ;;  %v244_v1 = vld [vmem:[%s1007_s1 + $0x8] sm:$0xff]  ;;  %v338_v7 = vld [vmem:[#allocation2 + $0x10] sm:$0xff]  ;;  %s231_s23 = sand.u32 1, %s809_s19  }
  0x35   : > { %798 = vsyncadd (%p1021_p0), [#allocation3], 4294965248  ;;  %p235_p5 = scmp.lt.s32.totalorder %s549_s6, 7  ;;  %v625_v3 = vpack.c.bf16 %v244_v1, %v243_v0  ;;  %v336_v4 = vld [vmem:[#allocation2] sm:$0xff]  ;;  %v337_v5 = vld [vmem:[#allocation2 + $0x8] sm:$0xff]  ;;  %s548_s25 = sshll.u32 %s231_s23, 4 }
  0x36   : > { %v629_v6 = vpack.c.bf16 %v337_v5, %v336_v4  ;;  %v339_v8 = vld [vmem:[#allocation2 + $0x18] sm:$0xff]  ;;  %v340_v10 = vld [vmem:[#allocation2 + $0x20] sm:$0xff]  ;;  %v341_v11 = vld [vmem:[#allocation2 + $0x28] sm:$0xff]  ;;  %s560_s26 = sshll.u32 %s876_s22, 8  ;;  %s965_s7 = scalar_lea.sflag [#allocation4], %s231_s23 }
  0x37   : > { %s1029_s6 = smov (!%p235_p5, %s549_s6), 7  ;;  %626 = vmatprep.subr.bf16.mxu0 %v625_v3  ;;  %v633_v9 = vpack.c.bf16 %v339_v8, %v338_v7  ;;  %v637_v13 = vpack.c.bf16 %v341_v11, %v340_v10  ;;  %v342_v14 = vld [vmem:[#allocation2 + $0x30] sm:$0xff]  ;;  %v343_v15 = vld [vmem:[#allocation2 + $0x38] sm:$0xff]  ;;  %v344_v17 = vld [vmem:[#allocation2 + $0x40] sm:$0xff]  ;;  %p1022_p9 = scmp.ne.s32.totalorder %s1015_s28, 0 }
  0x38   : > { %s550_s9 = sshll.u32 %s1029_s6, 3  ;;  %628 = vmatpush3.bf16.msra.mxu0 %v625_v3  ;;  %630 = vmatprep.subr.bf16.mxu1 %v629_v6  ;;  %v641_v16 = vpack.c.bf16 %v343_v15, %v342_v14  ;;  %v345_v18 = vld [vmem:[#allocation2 + $0x48] sm:$0xff]  ;;  %v346_v20 = vld [vmem:[#allocation2 + $0x50] sm:$0xff]  ;;  %v347_v21 = vld [vmem:[#allocation2 + $0x58] sm:$0xff]  ;;  %s233_s6 = scalar_lea.vmem [#allocation5], %s548_s25 }
  0x39   : > { %s238_s11 = scalar_lea.vmem %s1006_s0, %s550_s9  ;;  %632 = vmatpush3.bf16.msra.mxu1 %v629_v6  ;;  %v645_v19 = vpack.c.bf16 %v345_v18, %v344_v17  ;;  %v649_v22 = vpack.c.bf16 %v347_v21, %v346_v20  ;;  %v348_v23 = vld [vmem:[#allocation2 + $0x60] sm:$0xff]  ;;  %v349_v24 = vld [vmem:[#allocation2 + $0x68] sm:$0xff]  ;;  %v350_v26 = vld [vmem:[#allocation2 + $0x70] sm:$0xff]  ;;  %s468_s9 = sshll.u32 %s233_s6, 4  ;;  %s963_s9 = int_to_ptr.vmem [resolvable:$true] %s468_s9 }
  0x3a   : > { %v241_v2 = vld [vmem:[%s238_s11] sm:$0xff]  ;;  %v242_v12 = vld [vmem:[%s238_s11 + $0x8] sm:$0xff]  ;;  %634 = vmatprep.subr.bf16.mxu1 %v633_v9  ;;  %v653_v25 = vpack.c.bf16 %v349_v24, %v348_v23  ;;  %v351_v27 = vld [vmem:[#allocation2 + $0x78] sm:$0xff]  ;;  %s961_s11 = scalar_lea.hbm %s1011_s5, %s560_s26  ;;  %s751_s12 = scalar_lea.vmem %s963_s9, 256 }
  0x3b   : > { %587 = vmatprep.mubr.msk.f32.mxu0 %vm252_vm0, %v241_v2  ;;  %v657_v28 = vpack.c.bf16 %v351_v27, %v350_v26  ;;  %v551_v29 = vld [vmem:[%s1008_s2] ss:$0 sm:$0xff]  ;;  %p752_p6 = scmp.ne.s32.totalorder %s963_s9, %s751_s12  ;;  %s822_s22 = smov [#allocation5]  }
  0x3c   : > { %588 = vmatmul.mubr.msk.f32.vlgmr.msra.gmra.mrb[0].mxu0 %vm252_vm0, %v242_v12  ;;  %v554_v36 = vld [vmem:[%s1010_s4] ss:$0 sm:$0xff]  ;;  %s755_s30 = sshll.u32 %s822_s22, 4  ;;  %s756_s30 = int_to_ptr.vmem [resolvable:$false] %s755_s30 }
  0x3d   : > { %636 = vmatpush3.bf16.msra.mxu1 %v633_v9  ;;  %p753_p10 = pnand %p752_p6, %p1022_p9  ;;  %s757_s13 = scalar_lea.vmem %s756_s30, 512 }
  0x3e   : > { %638 = vmatprep.subr.bf16.mxu1 %v637_v13  ;;  %p758_p2 = scmp.lt.s32.totalorder %s963_s9, %s756_s30  ;;  %p759_p3 = scmp.lt.s32.totalorder %s757_s13, %s751_s12 }
  0x3f   : > { %p754_p12 = pneg %p753_p10 }
  0x40   : > { %p760_p4 = por %p759_p3, %p758_p2 }
  0x41   : > { %640 = vmatpush3.bf16.msra.mxu1 %v637_v13 }
  0x42   : > { %642 = vmatprep.subr.bf16.mxu1 %v641_v16  ;;  %p761_p7 = pnand %p760_p4, %p754_p12 }
  0x45   : > { %644 = vmatpush3.bf16.msra.mxu1 %v641_v16 }
  0x46   : > { %646 = vmatprep.subr.bf16.mxu1 %v645_v19 }
  0x49   : > { %648 = vmatpush3.bf16.msra.mxu1 %v645_v19 }
  0x4a   : > { %650 = vmatprep.subr.bf16.mxu1 %v649_v22 }
  0x4d   : > { %652 = vmatpush3.bf16.msra.mxu1 %v649_v22 }
  0x4e   : > { %654 = vmatprep.subr.bf16.mxu1 %v653_v25 }
  0x51   : > { %656 = vmatpush3.bf16.msra.mxu1 %v653_v25 }
  0x52   : > { %658 = vmatprep.subr.bf16.mxu1 %v657_v28 }
  0x55   : > { %660 = vmatpush3.bf16.msra.mxu1 %v657_v28 }
 0x10f   : > { %v589_v30 = vpop.f32.mrb[0].mxu0 }
 0x110   : > { %v331_v31 = vadd.f32 %v589_v30, %v551_v29  ;;  %v325_v32 = vpop.f32.mrb[1].mxu0 }
 0x111   : > { %v326_v33 = vadd.f32 %v551_v29, %v325_v32 }
 0x112   : > { %v335_v35 = vmax.f32 %v331_v31, 0.0 }
 0x113   : > { %v334_v34 = vmax.f32 %v326_v33, 0.0 }
 0x115   : > { %622 = vmatprep.mubr.f32.mxu1 %v334_v34 }
 0x116   : > { %623 = vmatmul.mubr.f32.vlgmr.msra.gmra.mrb[0].mxu1 %v335_v35 }
 0x1e9   : > { %v624_v37 = vpop.f32.mrb[0].mxu1 }
 0x1ea   : > { %v425_v38 = vpop.f32.mrb[1].mxu1  ;;  %v431_v40 = vadd.f32 %v624_v37, %v554_v36 }
 0x1eb   : > { %v426_v39 = vadd.f32 %v554_v36, %v425_v38 }
 0x1ed   : > { %434 = vmax.xlane.f32.xlu0 %v426_v39 }
 0x1f1   : > { %436 = vmax.xlane.f32.xlu0 %v431_v40 }
 0x27a   : > { %v435_v41 = vpop.xlane.xlu0 %434 }
 0x27b   : > { %v438_v42 = vsub.f32 %v426_v39, %v435_v41 }
 0x27d   : > { %v440_v43 = vmul.f32 1.442695, %v438_v42 }
 0x27e   : > { %v437_v44 = vpop.xlane.xlu0 %436 }
 0x27f   : > { %715 = vpow2.f32 %v440_v43  ;;  %v439_v45 = vsub.f32 %v431_v40, %v437_v44 }
 0x281   : > { %v442_v46 = vmul.f32 1.442695, %v439_v45 }
 0x283   : > { %717 = vpow2.f32 %v442_v46 }
 0x289   : > { %v716_v47 = vpop.eup %715 }
 0x28a   : > { %444 = vadd.xlane.f32.xlu1 %v716_v47 }
 0x28d   : > { %v718_v48 = vpop.eup %717 }
 0x28e   : > { %446 = vadd.xlane.f32.xlu1 %v718_v48 }
 0x317   : > { %v445_v49 = vpop.xlane.xlu1 %444 }
 0x318   : > { %719 = vrcp.f32 %v445_v49 }
 0x31b   : > { %v447_v50 = vpop.xlane.xlu1 %446 }
 0x31c   : > { %721 = vrcp.f32 %v447_v50 }
 0x322   : > { %v720_v51 = vpop.eup %719 }
 0x323   : > { %v450_v52 = vmul.f32 %v720_v51, %v716_v47 }
 0x325   : > { %452 = vst [vmem:[%s233_s6] sm:$0xff] %v450_v52 }
 0x326   : > { %v722_v53 = vpop.eup %721 }
 0x327   : > { %v451_v54 = vmul.f32 %v722_v53, %v718_v48 }
 0x329   : > { %453 = vst [vmem:[%s233_s6 + $0x8] sm:$0xff] %v451_v54 }
 0x32a   : > { %764 = shalt.err (!%p761_p7)
}
 0x32b   : > { %s765_s14 = scalar_lea.hbm %s961_s11, 256  ;;  %s769_s17 = scalar_lea.hbm %s1011_s5, 1024 }
 0x32c   : > { %p766_p8 = scmp.ne.s32.totalorder %s961_s11, %s765_s14  ;;  %p770_p1 = scmp.lt.u32.totalorder %s961_s11, %s1011_s5 }
 0x32d   : > { %p771_p0 = scmp.lt.u32.totalorder %s769_s17, %s765_s14  ;;  %p773_p6 = scmp.lt.u32.totalorder %s765_s14, %s961_s11 }
 0x32e   : > { %p767_p11 = pnand %p766_p8, %p1022_p9 }
 0x32f   : > { %p772_p5 = por %p771_p0, %p770_p1 }
 0x330   : > { %p768_p13 = pneg %p767_p11 }
 0x331   : > { %p774_p10 = por %p773_p6, %p772_p5 }
 0x333   : > { %p775_p12 = pnand %p774_p10, %p768_p13 }
 0x335   : > { %778 = shalt.err (!%p775_p12)
}
 0x336   : > { %s823_s26 = smov 128   ;;  %s824_s6 = smov 8  }
 0x337   : > { %665 = dma.vmem_to_hbm [thread:$0]  (%p1022_p9), %s963_s9, 256, %s961_s11, %s965_s7, %s823_s26, %s823_s26, %s824_s6  }
 0x338 PF: > { %p677_p2 = scmp.ge.s32.totalorder %s817_s21, 2  ;;  %s483_s8 = sand.u32 1, %s805_s18  }
 0x339   : > { %p1023_p3 = scmp.ne.s32.totalorder %s1016_s29, 0  ;;  %s484_s10 = scalar_lea.sflag [#allocation4], %s483_s8 }
 0x33b   : > { %p672_p4 = pnand %p677_p2, %p1023_p3 }
 0x33d   : > { %800 = dma.done.wait (!%p672_p4), %s484_s10, 256  }
 0x33e   : > { %802 = vsyncadd (!%p672_p4), %s484_s10, 4294967040  ;;  %p16_p7 = scmp.ge.s32.totalorder %s880_s24, 6   ;;  %s1024_s18 = smov %s809_s19 }
 0x33f   : > { %s1025_s19 = smov %s813_s20  ;;  %s1026_s20 = smov %s891_s27 }
 0x340   : > { %s1027_s21 = smov %s880_s24  ;;  %18 = sbr.rel (!%p16_p7) target bundleno = 4 (0x4), region = 80 }
 0x347   :  { %489 = vsyncpa [#allocation3], 1 }
 0x348   :  { %491 = vsyncpa [#allocation3 + $0x1], 1 }
 0x349   :  { %492 = vsyncpa [#allocation4], 1 }
 0x34a   :  { %494 = vsyncpa [#allocation4 + $0x1], 1 }

</bundles_post_ra>
